<compile_context>
chip_gen: v5e
topology: v5e:2x2
jax: 0.10.0
libtpu: 0.0.40
codegen_flags: <defaults>
</compile_context>

<pallas_src>
import functools

import jax
import jax.numpy as jnp
from jax import lax
from jax.experimental import pallas as pl
from jax.experimental.pallas import tpu as pltpu


# ----------------------------------------------------------------------------
# Helpers
# ----------------------------------------------------------------------------
def _round_up(x, m):
    return ((x + m - 1) // m) * m


def _pad2d(x, rows, cols):
    r, c = x.shape
    if r == rows and c == cols:
        return x
    return jnp.pad(x, ((0, rows - r), (0, cols - c)))


def _pick_tile(dim, candidates):
    for c in candidates:
        if c <= dim and dim % c == 0:
            return c
    return dim


def _masked_log_softmax_f32(x, n_valid_cols):
    """Row-wise log_softmax in fp32 with padded class columns masked out."""
    cols = lax.broadcasted_iota(jnp.int32, x.shape, 1)
    x = jnp.where(cols < n_valid_cols, x, -1e30)
    m = jnp.max(x, axis=1, keepdims=True)
    s = x - m
    lse = jnp.log(jnp.sum(jnp.exp(s), axis=1, keepdims=True))
    return s - lse


# ----------------------------------------------------------------------------
# Generic tiled matmul kernel:  out = epilogue(A @ B [+ bias])
# ----------------------------------------------------------------------------
def _matmul_kernel(*refs, has_bias, epilogue, n_valid_cols):
    if has_bias:
        a_ref, b_ref, bias_ref, o_ref, acc_ref = refs
    else:
        a_ref, b_ref, o_ref, acc_ref = refs
        bias_ref = None

    k = pl.program_id(2)

    @pl.when(k == 0)
    def _():
        acc_ref[...] = jnp.zeros_like(acc_ref)

    acc_ref[...] += jnp.dot(a_ref[...], b_ref[...],
                            preferred_element_type=jnp.float32)

    @pl.when(k == pl.num_programs(2) - 1)
    def _():
        out = acc_ref[...]
        if has_bias:
            out = out + bias_ref[...].astype(jnp.float32)
        if epilogue == "relu":
            out = jnp.maximum(out, 0.0)
        elif epilogue == "log_softmax":
            out = _masked_log_softmax_f32(out, n_valid_cols)
        o_ref[...] = out.astype(o_ref.dtype)


def pallas_matmul(a, b, bias=None, *, epilogue="none", n_valid_cols=0,
                  out_dtype=jnp.float32):
    """Tiled  epilogue(a @ b [+ bias]).

    Shapes must already be lane/sublane aligned:
      a: [M, K], b: [K, N], bias: [1, N];  M % 8 == 0, K % 128 == 0, N % 128 == 0.
    """
    M, K = a.shape
    K2, N = b.shape
    assert K == K2
    assert M % 8 == 0 and K % 128 == 0 and N % 128 == 0

    tm = _pick_tile(M, (256, 128, 8))
    tk = _pick_tile(K, (512, 256, 128))
    if epilogue == "log_softmax":
        tn = N                     # row-wise reduction needs the full class dim
    else:
        tn = _pick_tile(N, (256, 128))

    grid = (M // tm, N // tn, K // tk)

    in_specs = [
        pl.BlockSpec((tm, tk), lambda i, j, k: (i, k)),
        pl.BlockSpec((tk, tn), lambda i, j, k: (k, j)),
    ]
    operands = [a, b]
    if bias is not None:
        in_specs.append(pl.BlockSpec((1, tn), lambda i, j, k: (0, j)))
        operands.append(bias)

    kernel = functools.partial(
        _matmul_kernel,
        has_bias=bias is not None,
        epilogue=epilogue,
        n_valid_cols=n_valid_cols,
    )

    return pl.pallas_call(
        kernel,
        out_shape=jax.ShapeDtypeStruct((M, N), out_dtype),
        grid=grid,
        in_specs=in_specs,
        out_specs=pl.BlockSpec((tm, tn), lambda i, j, k: (i, j)),
        scratch_shapes=[pltpu.VMEM((tm, tn), jnp.float32)],
        compiler_params=pltpu.CompilerParams(
            dimension_semantics=("parallel", "parallel", "arbitrary"),
            vmem_limit_bytes=48 * 1024 * 1024,
        ),
    )(*operands)


# ----------------------------------------------------------------------------
# Fully fused single-call GCN kernel (small-graph regime: everything in VMEM)
# ----------------------------------------------------------------------------
def _fused_gcn_kernel(*refs, n_layer, n_valid_cols):
    # refs: x, adj, (W_0, b_0, ..., W_{L-1}, b_{L-1}), out
    x_ref, adj_ref = refs[0], refs[1]
    out_ref = refs[2 + 2 * n_layer]

    adj = adj_ref[...]
    x = x_ref[...]
    for i in range(n_layer):
        w = refs[2 + 2 * i][...]
        b = refs[3 + 2 * i][...]
        # support = x @ W   (MXU, fp32 accumulation)
        support = jnp.dot(x.astype(w.dtype), w, preferred_element_type=jnp.float32)
        # h = adj @ support + b
        h = jnp.dot(adj, support.astype(adj.dtype), preferred_element_type=jnp.float32)
        h = h + b.astype(jnp.float32)
        if i < n_layer - 1:
            x = jnp.maximum(h, 0.0)   # dropout(training=False) -> identity
        else:
            out_ref[...] = _masked_log_softmax_f32(h, n_valid_cols).astype(out_ref.dtype)


def fused_gcn(x, adj, ws, bs, *, n_valid_cols):
    n_layer = len(ws)
    operands = [x, adj]
    for w, b in zip(ws, bs):
        operands.append(w)
        operands.append(b)
    n_pad = x.shape[0]
    n_class_p = ws[-1].shape[1]

    kernel = functools.partial(_fused_gcn_kernel,
                               n_layer=n_layer, n_valid_cols=n_valid_cols)
    return pl.pallas_call(
        kernel,
        out_shape=jax.ShapeDtypeStruct((n_pad, n_class_p), jnp.float32),
        compiler_params=pltpu.CompilerParams(
            vmem_limit_bytes=48 * 1024 * 1024,
        ),
    )(*operands)


# ----------------------------------------------------------------------------
# GCN forward
# ----------------------------------------------------------------------------
def _gcn_forward_impl(feature, adj, params, n_class, compute_dtype, use_fused):
    n_nodes, n_feat = feature.shape
    n_pad = _round_up(n_nodes, 128)

    adj_p = _pad2d(adj, n_pad, n_pad).astype(compute_dtype)
    x = _pad2d(feature, n_pad, _round_up(n_feat, 128)).astype(compute_dtype)

    ws, bs = [], []
    for (w, b) in params:
        f_in, f_out = w.shape
        ws.append(_pad2d(w, _round_up(f_in, 128),
                         _round_up(f_out, 128)).astype(compute_dtype))
        bs.append(_pad2d(b, 1, _round_up(f_out, 128)).astype(jnp.float32))

    n_valid_cols = params[-1][0].shape[1]
    n_layer = len(params)

    if use_fused is None:
        # Rough fp32 footprint of the fully-resident path (operands + output
        # + a few live intermediates).  Engage only with ample VMEM headroom.
        max_dim = max([x.shape[1]] + [w.shape[1] for w in ws])
        elems = (adj_p.size + x.size + sum(w.size for w in ws)
                 + sum(b.size for b in bs)
                 + 3 * n_pad * max_dim + n_pad * ws[-1].shape[1])
        use_fused = (elems * 4) <= 8 * 1024 * 1024

    if use_fused:
        out = fused_gcn(x, adj_p, ws, bs, n_valid_cols=n_valid_cols)
    else:
        out = None
        for i in range(n_layer):
            # support = x @ W   (computed once, not per adj-row tile)
            support = pallas_matmul(x, ws[i], out_dtype=compute_dtype)
            if i < n_layer - 1:
                # x = relu(adj @ support + b); dropout(training=False) -> identity
                x = pallas_matmul(adj_p, support, bs[i], epilogue="relu",
                                  out_dtype=compute_dtype)
            else:
                out = pallas_matmul(adj_p, support, bs[i], epilogue="log_softmax",
                                    n_valid_cols=n_valid_cols, out_dtype=jnp.float32)

    return out[:n_nodes, :n_class]


@functools.partial(jax.jit, static_argnames=("n_class", "compute_dtype", "use_fused"))
def gcn_forward(feature, adj, params, n_class, compute_dtype=jnp.float32,
                use_fused=None):
    """params: list of (W, b) per layer.  Returns log-probs [n_nodes, n_class]."""
    return _gcn_forward_impl(feature, adj, params, n_class, compute_dtype, use_fused)


# ----------------------------------------------------------------------------
# Deterministic parameter construction + pure-JAX reference
# ----------------------------------------------------------------------------
def init_params(key, n_layer, n_feature, n_hidden, n_class):
    params = []
    for i in range(n_layer):
        dim_in = n_feature if i == 0 else n_hidden
        dim_out = n_class if i == n_layer - 1 else n_hidden
        key, kw, kb = jax.random.split(key, 3)
        bound = 1.0 / jnp.sqrt(dim_out)
        w = jax.random.uniform(kw, (dim_in, dim_out), jnp.float32, -bound, bound)
        b = jax.random.uniform(kb, (1, dim_out), jnp.float32, -bound, bound)
        params.append((w, b))
    return params


def reference_forward(feature, adj, params):
    x = feature
    n_layer = len(params)
    for i, (w, b) in enumerate(params):
        x = adj @ (x @ w) + b
        if i < n_layer - 1:
            x = jnp.maximum(x, 0.0)
    return jax.nn.log_softmax(x, axis=1)


if __name__ == "__main__":
    n_layer, n_feature, n_hidden, n_class = 2, 16, 32, 8
    n_nodes = 8

    key = jax.random.PRNGKey(0)
    key, kf, ka = jax.random.split(key, 3)
    feature = jax.random.normal(kf, (n_nodes, n_feature), jnp.float32)

    # symmetric-normalized adjacency-like matrix (Laplacian stand-in)
    a = jax.random.uniform(ka, (n_nodes, n_nodes), jnp.float32)
    a = (a + a.T) * 0.5 + jnp.eye(n_nodes)
    deg_inv_sqrt = 1.0 / jnp.sqrt(jnp.sum(a, axis=1))
    adj = deg_inv_sqrt[:, None] * a * deg_inv_sqrt[None, :]

    params = init_params(key, n_layer, n_feature, n_hidden, n_class)
    with jax.default_matmul_precision("float32"):
        ref = jax.block_until_ready(reference_forward(feature, adj, params))

    # fp32, fused single-call path (auto-selected at these shapes).
    out_fused = jax.block_until_ready(
        gcn_forward(feature, adj, params, n_class, compute_dtype=jnp.float32))
    assert out_fused.shape == (n_nodes, n_class)
    assert jnp.allclose(out_fused, ref, atol=2e-3, rtol=2e-3)

    # fp32, general tiled-matmul path (forced).
    out_tiled = jax.block_until_ready(
        gcn_forward(feature, adj, params, n_class, compute_dtype=jnp.float32,
                    use_fused=False))
    assert out_tiled.shape == (n_nodes, n_class)
    assert jnp.allclose(out_tiled, ref, atol=2e-3, rtol=2e-3)

    # bf16-MXU path (fp32 accumulation, fp32 elementwise): loose check.
    out_bf16 = jax.block_until_ready(
        gcn_forward(feature, adj, params, n_class, compute_dtype=jnp.bfloat16))
    assert out_bf16.shape == (n_nodes, n_class)
    assert jnp.allclose(out_bf16, ref, atol=1e-1, rtol=1e-1)

    print("KERNEL_OK")
</pallas_src>

<mosaic_0001>
module attributes {stable_mosaic.version = 11 : i64} {
  func.func @_fused_gcn_kernel(%arg0: memref<128x128xf32, #tpu.memory_space<vmem>>, %arg1: memref<128x128xf32, #tpu.memory_space<vmem>>, %arg2: memref<128x128xf32, #tpu.memory_space<vmem>>, %arg3: memref<1x128xf32, #tpu.memory_space<vmem>>, %arg4: memref<128x128xf32, #tpu.memory_space<vmem>>, %arg5: memref<1x128xf32, #tpu.memory_space<vmem>>, %arg6: memref<128x128xf32, #tpu.memory_space<vmem>>) attributes {dimension_semantics = [], scalar_prefetch = 0 : i64, scratch_operands = 0 : i64, tpu.core_type = #tpu.core_type<tc>} {
    %c0 = arith.constant 0 : index
    %c0_0 = arith.constant 0 : index
    %0 = vector.load %arg1[%c0, %c0_0] : memref<128x128xf32, #tpu.memory_space<vmem>>, vector<128x128xf32>
    %c0_1 = arith.constant 0 : index
    %c0_2 = arith.constant 0 : index
    %1 = vector.load %arg0[%c0_1, %c0_2] : memref<128x128xf32, #tpu.memory_space<vmem>>, vector<128x128xf32>
    %c0_3 = arith.constant 0 : index
    %c0_4 = arith.constant 0 : index
    %2 = vector.load %arg2[%c0_3, %c0_4] : memref<128x128xf32, #tpu.memory_space<vmem>>, vector<128x128xf32>
    %c0_5 = arith.constant 0 : index
    %c0_6 = arith.constant 0 : index
    %3 = vector.load %arg3[%c0_5, %c0_6] : memref<1x128xf32, #tpu.memory_space<vmem>>, vector<1x128xf32>
    %cst = arith.constant dense<0.000000e+00> : vector<128x128xf32>
    %4 = tpu.matmul %1, %2, %cst {dimension_numbers = #tpu.dot_dimension_numbers<[1], [0], [0], [1], [0, 0, 1, 1], [], []>} : vector<128x128xf32>, vector<128x128xf32>, vector<128x128xf32> -> vector<128x128xf32>
    %cst_7 = arith.constant dense<0.000000e+00> : vector<128x128xf32>
    %5 = tpu.matmul %0, %4, %cst_7 {dimension_numbers = #tpu.dot_dimension_numbers<[1], [0], [0], [1], [0, 0, 1, 1], [], []>} : vector<128x128xf32>, vector<128x128xf32>, vector<128x128xf32> -> vector<128x128xf32>
    %6 = vector.broadcast %3 : vector<1x128xf32> to vector<128x128xf32>
    %7 = arith.addf %5, %6 : vector<128x128xf32>
    %cst_8 = arith.constant 0.000000e+00 : f32
    %8 = vector.broadcast %cst_8 : f32 to vector<128x128xf32>
    %9 = arith.maximumf %7, %8 : vector<128x128xf32>
    %c0_9 = arith.constant 0 : index
    %c0_10 = arith.constant 0 : index
    %10 = vector.load %arg4[%c0_9, %c0_10] : memref<128x128xf32, #tpu.memory_space<vmem>>, vector<128x128xf32>
    %c0_11 = arith.constant 0 : index
    %c0_12 = arith.constant 0 : index
    %11 = vector.load %arg5[%c0_11, %c0_12] : memref<1x128xf32, #tpu.memory_space<vmem>>, vector<1x128xf32>
    %cst_13 = arith.constant dense<0.000000e+00> : vector<128x128xf32>
    %12 = tpu.matmul %9, %10, %cst_13 {dimension_numbers = #tpu.dot_dimension_numbers<[1], [0], [0], [1], [0, 0, 1, 1], [], []>} : vector<128x128xf32>, vector<128x128xf32>, vector<128x128xf32> -> vector<128x128xf32>
    %cst_14 = arith.constant dense<0.000000e+00> : vector<128x128xf32>
    %13 = tpu.matmul %0, %12, %cst_14 {dimension_numbers = #tpu.dot_dimension_numbers<[1], [0], [0], [1], [0, 0, 1, 1], [], []>} : vector<128x128xf32>, vector<128x128xf32>, vector<128x128xf32> -> vector<128x128xf32>
    %14 = vector.broadcast %11 : vector<1x128xf32> to vector<128x128xf32>
    %15 = arith.addf %13, %14 : vector<128x128xf32>
    %16 = tpu.iota {dimensions = array<i32: 1>} : vector<128x128xi32>
    %c8_i32 = arith.constant 8 : i32
    %17 = vector.broadcast %c8_i32 : i32 to vector<128x128xi32>
    %18 = arith.cmpi slt, %16, %17 : vector<128x128xi32>
    %cst_15 = arith.constant -1.000000e+30 : f32
    %19 = vector.broadcast %cst_15 : f32 to vector<128x128xf32>
    %20 = arith.select %18, %15, %19 : vector<128x128xi1>, vector<128x128xf32>
    %cst_16 = arith.constant dense<0xFF800000> : vector<128xf32>
    %21 = vector.multi_reduction <maximumf>, %20, %cst_16 [1] : vector<128x128xf32> to vector<128xf32>
    %22 = vector.shape_cast %21 : vector<128xf32> to vector<128x1xf32>
    %23 = vector.broadcast %22 : vector<128x1xf32> to vector<128x128xf32>
    %24 = arith.subf %20, %23 : vector<128x128xf32>
    %25 = math.exp %24 : vector<128x128xf32>
    %cst_17 = arith.constant dense<0.000000e+00> : vector<128xf32>
    %26 = vector.multi_reduction <add>, %25, %cst_17 [1] : vector<128x128xf32> to vector<128xf32>
    %27 = vector.shape_cast %26 : vector<128xf32> to vector<128x1xf32>
    %28 = math.log %27 : vector<128x1xf32>
    %29 = vector.broadcast %28 : vector<128x1xf32> to vector<128x128xf32>
    %30 = arith.subf %24, %29 : vector<128x128xf32>
    %c0_18 = arith.constant 0 : index
    %c0_19 = arith.constant 0 : index
    %31 = vector.load %arg6[%c0_18, %c0_19] : memref<128x128xf32, #tpu.memory_space<vmem>>, vector<128x128xf32>
    tpu.vector_store %arg6[%c0_18, %c0_19], %30 {strides = array<i32>} : memref<128x128xf32, #tpu.memory_space<vmem>>, vector<128x128xf32>,
    return
  }
}

</mosaic_0001>

<bundles_post_ra>
// kernel: gcn_forward.1
= control target key start
LH: loop header
LB: loop body
LE: loop exit
PB: predicated region body
PF: predicated region fallthrough
CT: control target
= control target key end

     0   :  { %s1158_s2 = inlined_call_operand.vmem [shape: f32[128,128], index: 2, kind: input, shape index: {}]   ;;  %s1159_s0 = inlined_call_operand.vmem [shape: f32[128,128], index: 0, kind: input, shape index: {}]   ;;  %s1160_s3 = inlined_call_operand.vmem [shape: f32[1,128], index: 3, kind: input, shape index: {}]   ;;  %s1161_s1 = inlined_call_operand.vmem [shape: f32[128,128], index: 1, kind: input, shape index: {}]   ;;  %s1162_s4 = inlined_call_operand.vmem [shape: f32[128,128], index: 4, kind: input, shape index: {}]   ;;  %s1163_s5 = inlined_call_operand.vmem [shape: f32[1,128], index: 5, kind: input, shape index: {}]   ;;  %s1164_s6 = inlined_call_operand.vmem [shape: f32[128,128], index: 6, kind: output, shape index: {}]  }
   0x1   :  { %v70_v0 = vld [vmem:[%s1158_s2 + $0x78] sm:$0xff]  ;;  %v69_v1 = vld [vmem:[%s1158_s2 + $0x70] sm:$0xff]  ;;  %v68_v2 = vld [vmem:[%s1158_s2 + $0x68] sm:$0xff] }
   0x2   :  { %72 = vmatpush.msra.mxu0 %v70_v0  ;;  %v67_v3 = vld [vmem:[%s1158_s2 + $0x60] sm:$0xff]  ;;  %v66_v4 = vld [vmem:[%s1158_s2 + $0x58] sm:$0xff]  ;;  %v65_v5 = vld [vmem:[%s1158_s2 + $0x50] sm:$0xff] }
   0x3   :  { %v64_v6 = vld [vmem:[%s1158_s2 + $0x48] sm:$0xff]  ;;  %v63_v7 = vld [vmem:[%s1158_s2 + $0x40] sm:$0xff]  ;;  %v62_v8 = vld [vmem:[%s1158_s2 + $0x38] sm:$0xff] }
   0x4   :  { %73 = vmatpush.msra.mxu0 %v69_v1  ;;  %v61_v9 = vld [vmem:[%s1158_s2 + $0x30] sm:$0xff]  ;;  %v60_v10 = vld [vmem:[%s1158_s2 + $0x28] sm:$0xff]  ;;  %v59_v11 = vld [vmem:[%s1158_s2 + $0x20] sm:$0xff] }
   0x5   :  { %v58_v12 = vld [vmem:[%s1158_s2 + $0x18] sm:$0xff]  ;;  %v57_v13 = vld [vmem:[%s1158_s2 + $0x10] sm:$0xff]  ;;  %v56_v14 = vld [vmem:[%s1158_s2 + $0x8] sm:$0xff] }
   0x6   :  { %74 = vmatpush.msra.mxu0 %v68_v2  ;;  %v55_v15 = vld [vmem:[%s1158_s2] sm:$0xff]  ;;  %v40_v17 = vld [vmem:[%s1159_s0 + $0x8] sm:$0xff]  ;;  %v41_v18 = vld [vmem:[%s1159_s0 + $0x10] sm:$0xff] }
   0x7   :  { %v39_v16 = vld [vmem:[%s1159_s0] sm:$0xff]  ;;  %v42_v19 = vld [vmem:[%s1159_s0 + $0x18] sm:$0xff]  ;;  %v44_v21 = vld [vmem:[%s1159_s0 + $0x28] sm:$0xff] }
   0x8   :  { %75 = vmatpush.msra.mxu0 %v67_v3  ;;  %v43_v20 = vld [vmem:[%s1159_s0 + $0x20] sm:$0xff]  ;;  %v45_v22 = vld [vmem:[%s1159_s0 + $0x30] sm:$0xff]  ;;  %v46_v23 = vld [vmem:[%s1159_s0 + $0x38] sm:$0xff] }
   0x9   :  { %v47_v24 = vld [vmem:[%s1159_s0 + $0x40] sm:$0xff]  ;;  %v48_v25 = vld [vmem:[%s1159_s0 + $0x48] sm:$0xff]  ;;  %v49_v26 = vld [vmem:[%s1159_s0 + $0x50] sm:$0xff] }
   0xa   :  { %76 = vmatpush.msra.mxu0 %v66_v4  ;;  %v50_v27 = vld [vmem:[%s1159_s0 + $0x58] sm:$0xff]  ;;  %v51_v28 = vld [vmem:[%s1159_s0 + $0x60] sm:$0xff]  ;;  %v52_v29 = vld [vmem:[%s1159_s0 + $0x68] sm:$0xff] }
   0xb   :  { %v53_v30 = vld [vmem:[%s1159_s0 + $0x70] sm:$0xff]  ;;  %v54_v31 = vld [vmem:[%s1159_s0 + $0x78] sm:$0xff]  ;;  %v770_v48 = vld [vmem:[%s1161_s1] sm:$0xff] }
   0xc   :  { %77 = vmatpush.msra.mxu0 %v65_v5  ;;  %v776_v49 = vld [vmem:[%s1161_s1 + $0x8] sm:$0xff]  ;;  %v782_v50 = vld [vmem:[%s1161_s1 + $0x10] sm:$0xff]  ;;  %v788_v51 = vld [vmem:[%s1161_s1 + $0x18] sm:$0xff] }
   0xd   :  { %v794_v52 = vld [vmem:[%s1161_s1 + $0x20] sm:$0xff]  ;;  %v800_v53 = vld [vmem:[%s1161_s1 + $0x28] sm:$0xff]  ;;  %v806_v54 = vld [vmem:[%s1161_s1 + $0x30] sm:$0xff] }
   0xe   :  { %78 = vmatpush.msra.mxu0 %v64_v6  ;;  %v812_v55 = vld [vmem:[%s1161_s1 + $0x38] sm:$0xff]  ;;  %v818_v56 = vld [vmem:[%s1161_s1 + $0x40] sm:$0xff]  ;;  %v235_v58 = vld [vmem:[%s1162_s4 + $0x70] sm:$0xff] }
   0xf   :  { %v236_v57 = vld [vmem:[%s1162_s4 + $0x78] sm:$0xff]  ;;  %v234_v59 = vld [vmem:[%s1162_s4 + $0x68] sm:$0xff]  ;;  %v233_v61 = vld [vmem:[%s1162_s4 + $0x60] sm:$0xff] }
  0x10   :  { %79 = vmatpush.msra.mxu0 %v63_v7  ;;  %238 = vmatpush.msra.mxu2 %v236_v57  ;;  %v833_v60 = vld [vmem:[%s1161_s1 + $0x48] sm:$0xff]  ;;  %v232_v62 = vld [vmem:[%s1162_s4 + $0x58] sm:$0xff]  ;;  %v231_v63 = vld [vmem:[%s1162_s4 + $0x50] sm:$0xff] }
  0x11   :  { %v230_v0 = vld [vmem:[%s1162_s4 + $0x48] sm:$0xff]  ;;  %v851_v1 = vld [vmem:[%s1161_s1 + $0x50] sm:$0xff]  ;;  %v229_v2 = vld [vmem:[%s1162_s4 + $0x40] sm:$0xff] }
  0x12   :  { %80 = vmatpush.msra.mxu0 %v62_v8  ;;  %239 = vmatpush.msra.mxu2 %v235_v58  ;;  %v228_v3 = vld [vmem:[%s1162_s4 + $0x38] sm:$0xff]  ;;  %v227_v4 = vld [vmem:[%s1162_s4 + $0x30] sm:$0xff]  ;;  %v226_v5 = vld [vmem:[%s1162_s4 + $0x28] sm:$0xff] }
  0x13   :  { %v869_v6 = vld [vmem:[%s1161_s1 + $0x58] sm:$0xff]  ;;  %v225_v7 = vld [vmem:[%s1162_s4 + $0x20] sm:$0xff] }
  0x14   :  { %81 = vmatpush.msra.mxu0 %v61_v9  ;;  %240 = vmatpush.msra.mxu2 %v234_v59  ;;  %v224_v8 = vld [vmem:[%s1162_s4 + $0x18] sm:$0xff]  ;;  %v223_v9 = vld [vmem:[%s1162_s4 + $0x10] sm:$0xff] }
  0x16   :  { %82 = vmatpush.msra.mxu0 %v60_v10  ;;  %241 = vmatpush.msra.mxu2 %v233_v61  ;;  %v884_v10 = vld [vmem:[%s1161_s1 + $0x60] sm:$0xff] }
  0x18   :  { %83 = vmatpush.msra.mxu0 %v59_v11  ;;  %242 = vmatpush.msra.mxu2 %v232_v62  ;;  %v222_v11 = vld [vmem:[%s1162_s4 + $0x8] sm:$0xff] }
  0x1a   :  { %84 = vmatpush.msra.mxu0 %v58_v12  ;;  %243 = vmatpush.msra.mxu2 %v231_v63  ;;  %v221_v12 = vld [vmem:[%s1162_s4] sm:$0xff] }
  0x1c   :  { %85 = vmatpush.msra.mxu0 %v57_v13  ;;  %244 = vmatpush.msra.mxu2 %v230_v0  ;;  %v896_v13 = vld [vmem:[%s1161_s1 + $0x68] sm:$0xff] }
  0x1e   :  { %86 = vmatpush.msra.mxu0 %v56_v14  ;;  %245 = vmatpush.msra.mxu2 %v229_v2  ;;  %v902_v14 = vld [vmem:[%s1161_s1 + $0x70] sm:$0xff] }
  0x20   :  { %87 = vmatpush.msra.mxu0 %v55_v15  ;;  %246 = vmatpush.msra.mxu2 %v228_v3  ;;  %v908_v15 = vld [vmem:[%s1161_s1 + $0x78] sm:$0xff] }
  0x21   :  { %88 = vmatmul.f32.vlgmr.msra.gmra.mxu0 %v39_v16  ;;  %v570_v16 = vld [vmem:[%s1160_s3] ss:$0 sm:$0xff] }
  0x22   :  { %247 = vmatpush.msra.mxu2 %v227_v4 }
  0x24   :  { %248 = vmatpush.msra.mxu2 %v226_v5 }
  0x26   :  { %249 = vmatpush.msra.mxu2 %v225_v7 }
  0x28   :  { %250 = vmatpush.msra.mxu2 %v224_v8 }
  0x29   :  { %91 = vmatmul.f32.gmra.mxu0 %v40_v17 }
  0x2a   :  { %251 = vmatpush.msra.mxu2 %v223_v9 }
  0x2c   :  { %252 = vmatpush.msra.mxu2 %v222_v11 }
  0x2e   :  { %253 = vmatpush.msra.mxu2 %v221_v12 }
  0x31   :  { %94 = vmatmul.f32.gmra.mxu0 %v41_v18 }
  0x39   :  { %97 = vmatmul.f32.gmra.mxu0 %v42_v19 }
  0x41   :  { %100 = vmatmul.f32.gmra.mxu0 %v43_v20 }
  0x49   :  { %103 = vmatmul.f32.gmra.mxu0 %v44_v21 }
  0x51   :  { %106 = vmatmul.f32.gmra.mxu0 %v45_v22 }
  0x59   :  { %109 = vmatmul.f32.gmra.mxu0 %v46_v23 }
  0x61   :  { %112 = vmatmul.f32.gmra.mxu0 %v47_v24 }
  0x69   :  { %115 = vmatmul.f32.gmra.mxu0 %v48_v25 }
  0x71   :  { %118 = vmatmul.f32.gmra.mxu0 %v49_v26 }
  0x79   :  { %121 = vmatmul.f32.gmra.mxu0 %v50_v27 }
  0x81   :  { %124 = vmatmul.f32.gmra.mxu0 %v51_v28 }
  0x89   :  { %127 = vmatmul.f32.gmra.mxu0 %v52_v29 }
  0x91   :  { %130 = vmatmul.f32.gmra.mxu0 %v53_v30 }
  0x99   :  { %133 = vmatmul.f32.gmra.mxu0 %v54_v31 }
  0x9e   :  { %v89_v32 = vpop.f32.mrf.mxu0 }
  0xa6   :  { %v92_v33 = vpop.f32.mrf.mxu0 }
  0xae   :  { %v95_v34 = vpop.f32.mrf.mxu0 }
  0xb6   :  { %v98_v35 = vpop.f32.mrf.mxu0 }
  0xbe   :  { %v101_v36 = vpop.f32.mrf.mxu0 }
  0xc6   :  { %v104_v37 = vpop.f32.mrf.mxu0 }
  0xce   :  { %v107_v38 = vpop.f32.mrf.mxu0 }
  0xd6   :  { %v110_v39 = vpop.f32.mrf.mxu0 }
  0xde   :  { %v113_v40 = vpop.f32.mrf.mxu0 }
  0xe6   :  { %v116_v41 = vpop.f32.mrf.mxu0 }
  0xee   :  { %v119_v42 = vpop.f32.mrf.mxu0 }
  0xf6   :  { %v122_v43 = vpop.f32.mrf.mxu0 }
  0xfe   :  { %v125_v44 = vpop.f32.mrf.mxu0 }
 0x106   :  { %v128_v45 = vpop.f32.mrf.mxu0 }
 0x10e   :  { %v131_v46 = vpop.f32.mrf.mxu0 }
 0x116   :  { %v134_v47 = vpop.f32.mrf.mxu0 }
 0x117   :  { %140 = vmatpush.msra.mxu1 %v134_v47 }
 0x119   :  { %141 = vmatpush.msra.mxu1 %v131_v46 }
 0x11b   :  { %142 = vmatpush.msra.mxu1 %v128_v45 }
 0x11d   :  { %143 = vmatpush.msra.mxu1 %v125_v44 }
 0x11f   :  { %144 = vmatpush.msra.mxu1 %v122_v43 }
 0x121   :  { %145 = vmatpush.msra.mxu1 %v119_v42 }
 0x123   :  { %146 = vmatpush.msra.mxu1 %v116_v41 }
 0x125   :  { %147 = vmatpush.msra.mxu1 %v113_v40 }
 0x127   :  { %148 = vmatpush.msra.mxu1 %v110_v39 }
 0x129   :  { %149 = vmatpush.msra.mxu1 %v107_v38 }
 0x12b   :  { %150 = vmatpush.msra.mxu1 %v104_v37 }
 0x12d   :  { %151 = vmatpush.msra.mxu1 %v101_v36 }
 0x12f   :  { %152 = vmatpush.msra.mxu1 %v98_v35 }
 0x131   :  { %153 = vmatpush.msra.mxu1 %v95_v34 }
 0x133   :  { %154 = vmatpush.msra.mxu1 %v92_v33 }
 0x135   :  { %155 = vmatpush.msra.mxu1 %v89_v32 }
 0x136   :  { %156 = vmatmul.f32.vlgmr.msra.gmra.mxu1 %v770_v48 }
 0x13e   :  { %159 = vmatmul.f32.gmra.mxu1 %v776_v49 }
 0x146   :  { %162 = vmatmul.f32.gmra.mxu1 %v782_v50 }
 0x14e   :  { %165 = vmatmul.f32.gmra.mxu1 %v788_v51 }
 0x156   :  { %168 = vmatmul.f32.gmra.mxu1 %v794_v52 }
 0x15e   :  { %171 = vmatmul.f32.gmra.mxu1 %v800_v53 }
 0x166   :  { %174 = vmatmul.f32.gmra.mxu1 %v806_v54 }
 0x16e   :  { %177 = vmatmul.f32.gmra.mxu1 %v812_v55 }
 0x176   :  { %180 = vmatmul.f32.gmra.mxu1 %v818_v56 }
 0x17e   :  { %183 = vmatmul.f32.gmra.mxu1 %v833_v60 }
 0x186   :  { %186 = vmatmul.f32.gmra.mxu1 %v851_v1 }
 0x18e   :  { %189 = vmatmul.f32.gmra.mxu1 %v869_v6 }
 0x196   :  { %192 = vmatmul.f32.gmra.mxu1 %v884_v10 }
 0x19e   :  { %195 = vmatmul.f32.gmra.mxu1 %v896_v13 }
 0x1a6   :  { %198 = vmatmul.f32.gmra.mxu1 %v902_v14 }
 0x1ae   :  { %201 = vmatmul.f32.gmra.mxu1 %v908_v15 }
 0x1b3   :  { %v157_v17 = vpop.f32.mrf.mxu1 }
 0x1b4   :  { %v158_v18 = vadd.f32 %v570_v16, %v157_v17 }
 0x1b6   :  { %v205_v19 = vmax.f32 %v158_v18, 0.0 }
 0x1b8   :  { %254 = vmatmul.f32.vlgmr.msra.gmra.mxu2 %v205_v19 }
 0x1bb   :  { %v160_v20 = vpop.f32.mrf.mxu1 }
 0x1bc   :  { %v161_v21 = vadd.f32 %v570_v16, %v160_v20 }
 0x1be   :  { %v206_v22 = vmax.f32 %v161_v21, 0.0 }
 0x1c0   :  { %257 = vmatmul.f32.gmra.mxu2 %v206_v22 }
 0x1c3   :  { %v163_v23 = vpop.f32.mrf.mxu1 }
 0x1c4   :  { %v164_v24 = vadd.f32 %v570_v16, %v163_v23 }
 0x1c6   :  { %v207_v25 = vmax.f32 %v164_v24, 0.0 }
 0x1c8   :  { %260 = vmatmul.f32.gmra.mxu2 %v207_v25 }
 0x1cb   :  { %v166_v26 = vpop.f32.mrf.mxu1 }
 0x1cc   :  { %v167_v27 = vadd.f32 %v570_v16, %v166_v26 }
 0x1ce   :  { %v208_v28 = vmax.f32 %v167_v27, 0.0 }
 0x1d0   :  { %263 = vmatmul.f32.gmra.mxu2 %v208_v28 }
 0x1d3   :  { %v169_v29 = vpop.f32.mrf.mxu1 }
 0x1d4   :  { %v170_v30 = vadd.f32 %v570_v16, %v169_v29 }
 0x1d6   :  { %v209_v31 = vmax.f32 %v170_v30, 0.0 }
 0x1d8   :  { %266 = vmatmul.f32.gmra.mxu2 %v209_v31 }
 0x1db   :  { %v172_v32 = vpop.f32.mrf.mxu1 }
 0x1dc   :  { %v173_v33 = vadd.f32 %v570_v16, %v172_v32 }
 0x1de   :  { %v210_v34 = vmax.f32 %v173_v33, 0.0 }
 0x1e0   :  { %269 = vmatmul.f32.gmra.mxu2 %v210_v34 }
 0x1e3   :  { %v175_v35 = vpop.f32.mrf.mxu1 }
 0x1e4   :  { %v176_v36 = vadd.f32 %v570_v16, %v175_v35 }
 0x1e6   :  { %v211_v37 = vmax.f32 %v176_v36, 0.0 }
 0x1e8   :  { %272 = vmatmul.f32.gmra.mxu2 %v211_v37 }
 0x1eb   :  { %v178_v38 = vpop.f32.mrf.mxu1 }
 0x1ec   :  { %v179_v39 = vadd.f32 %v570_v16, %v178_v38 }
 0x1ee   :  { %v212_v40 = vmax.f32 %v179_v39, 0.0 }
 0x1f0   :  { %275 = vmatmul.f32.gmra.mxu2 %v212_v40 }
 0x1f3   :  { %v181_v41 = vpop.f32.mrf.mxu1 }
 0x1f4   :  { %v182_v42 = vadd.f32 %v570_v16, %v181_v41 }
 0x1f6   :  { %v213_v43 = vmax.f32 %v182_v42, 0.0 }
 0x1f8   :  { %278 = vmatmul.f32.gmra.mxu2 %v213_v43 }
 0x1fb   :  { %v184_v44 = vpop.f32.mrf.mxu1 }
 0x1fc   :  { %v185_v45 = vadd.f32 %v570_v16, %v184_v44 }
 0x1fe   :  { %v214_v46 = vmax.f32 %v185_v45, 0.0 }
 0x200   :  { %281 = vmatmul.f32.gmra.mxu2 %v214_v46 }
 0x203   :  { %v187_v47 = vpop.f32.mrf.mxu1 }
 0x204   :  { %v188_v57 = vadd.f32 %v570_v16, %v187_v47 }
 0x206   :  { %v215_v58 = vmax.f32 %v188_v57, 0.0 }
 0x208   :  { %284 = vmatmul.f32.gmra.mxu2 %v215_v58 }
 0x20b   :  { %v190_v59 = vpop.f32.mrf.mxu1 }
 0x20c   :  { %v191_v61 = vadd.f32 %v570_v16, %v190_v59 }
 0x20e   :  { %v216_v62 = vmax.f32 %v191_v61, 0.0 }
 0x210   :  { %287 = vmatmul.f32.gmra.mxu2 %v216_v62 }
 0x213   :  { %v193_v63 = vpop.f32.mrf.mxu1 }
 0x214   :  { %v194_v0 = vadd.f32 %v570_v16, %v193_v63 }
 0x216   :  { %v217_v2 = vmax.f32 %v194_v0, 0.0 }
 0x218   :  { %290 = vmatmul.f32.gmra.mxu2 %v217_v2 }
 0x21b   :  { %v196_v3 = vpop.f32.mrf.mxu1 }
 0x21c   :  { %v197_v4 = vadd.f32 %v570_v16, %v196_v3 }
 0x21e   :  { %v218_v5 = vmax.f32 %v197_v4, 0.0 }
 0x220   :  { %293 = vmatmul.f32.gmra.mxu2 %v218_v5 }
 0x223   :  { %v199_v7 = vpop.f32.mrf.mxu1 }
 0x224   :  { %v200_v8 = vadd.f32 %v570_v16, %v199_v7 }
 0x226   :  { %v219_v9 = vmax.f32 %v200_v8, 0.0 }
 0x228   :  { %296 = vmatmul.f32.gmra.mxu2 %v219_v9 }
 0x22b   :  { %v202_v11 = vpop.f32.mrf.mxu1 }
 0x22c   :  { %v203_v12 = vadd.f32 %v570_v16, %v202_v11 }
 0x22e   :  { %v220_v17 = vmax.f32 %v203_v12, 0.0 }
 0x230   :  { %299 = vmatmul.f32.gmra.mxu2 %v220_v17 }
 0x23b   :  { %v255_v18 = vpop.f32.mrf.mxu2 }
 0x243   :  { %v258_v19 = vpop.f32.mrf.mxu2 }
 0x24b   :  { %v261_v20 = vpop.f32.mrf.mxu2 }
 0x253   :  { %v264_v21 = vpop.f32.mrf.mxu2 }
 0x25b   :  { %v267_v22 = vpop.f32.mrf.mxu2 }
 0x263   :  { %v270_v23 = vpop.f32.mrf.mxu2 }
 0x26b   :  { %v273_v24 = vpop.f32.mrf.mxu2 }
 0x273   :  { %v276_v25 = vpop.f32.mrf.mxu2 }
 0x27b   :  { %v279_v26 = vpop.f32.mrf.mxu2 }
 0x283   :  { %v282_v27 = vpop.f32.mrf.mxu2 }
 0x28b   :  { %v285_v28 = vpop.f32.mrf.mxu2 }
 0x293   :  { %v288_v29 = vpop.f32.mrf.mxu2 }
 0x29b   :  { %v291_v30 = vpop.f32.mrf.mxu2 }
 0x2a3   :  { %v294_v31 = vpop.f32.mrf.mxu2 }
 0x2ab   :  { %v297_v32 = vpop.f32.mrf.mxu2 }
 0x2b3   :  { %v300_v33 = vpop.f32.mrf.mxu2 }
 0x2b4   :  { %306 = vmatpush.msra.mxu3 %v300_v33 }
 0x2b6   :  { %307 = vmatpush.msra.mxu3 %v297_v32 }
 0x2b8   :  { %308 = vmatpush.msra.mxu3 %v294_v31 }
 0x2ba   :  { %309 = vmatpush.msra.mxu3 %v291_v30 }
 0x2bc   :  { %310 = vmatpush.msra.mxu3 %v288_v29 }
 0x2be   :  { %311 = vmatpush.msra.mxu3 %v285_v28 }
 0x2c0   :  { %312 = vmatpush.msra.mxu3 %v282_v27 }
 0x2c2   :  { %313 = vmatpush.msra.mxu3 %v279_v26 }
 0x2c4   :  { %314 = vmatpush.msra.mxu3 %v276_v25 }
 0x2c6   :  { %315 = vmatpush.msra.mxu3 %v273_v24 }
 0x2c8   :  { %316 = vmatpush.msra.mxu3 %v270_v23 }
 0x2ca   :  { %317 = vmatpush.msra.mxu3 %v267_v22 }
 0x2cc   :  { %318 = vmatpush.msra.mxu3 %v264_v21 }
 0x2ce   :  { %319 = vmatpush.msra.mxu3 %v261_v20 }
 0x2d0   :  { %320 = vmatpush.msra.mxu3 %v258_v19 }
 0x2d2   :  { %321 = vmatpush.msra.mxu3 %v255_v18 }
 0x2d3   :  { %322 = vmatmul.f32.vlgmr.msra.gmra.mxu3 %v770_v48  ;;  %v371_v48 = vlaneseq }
 0x2db   :  { %325 = vmatmul.f32.gmra.mxu3 %v776_v49  ;;  %v930_v49 = vand.u32 127, %v371_v48 }
 0x2dd   :  { %vm373_vm0 = vcmp.lt.s32.totalorder %v930_v49, 8 }
 0x2e3   :  { %328 = vmatmul.f32.gmra.mxu3 %v782_v50  ;;  %v935_v50 = vld [vmem:[%s1163_s5] ss:$0 sm:$0xff] }
 0x2eb   :  { %331 = vmatmul.f32.gmra.mxu3 %v788_v51 }
 0x2f3   :  { %334 = vmatmul.f32.gmra.mxu3 %v794_v52 }
 0x2fb   :  { %337 = vmatmul.f32.gmra.mxu3 %v800_v53 }
 0x303   :  { %340 = vmatmul.f32.gmra.mxu3 %v806_v54 }
 0x30b   :  { %343 = vmatmul.f32.gmra.mxu3 %v812_v55 }
 0x313   :  { %346 = vmatmul.f32.gmra.mxu3 %v818_v56 }
 0x31b   :  { %349 = vmatmul.f32.gmra.mxu3 %v833_v60 }
 0x323   :  { %352 = vmatmul.f32.gmra.mxu3 %v851_v1 }
 0x32b   :  { %355 = vmatmul.f32.gmra.mxu3 %v869_v6 }
 0x333   :  { %358 = vmatmul.f32.gmra.mxu3 %v884_v10 }
 0x33b   :  { %361 = vmatmul.f32.gmra.mxu3 %v896_v13 }
 0x343   :  { %364 = vmatmul.f32.gmra.mxu3 %v902_v14 }
 0x34b   :  { %367 = vmatmul.f32.gmra.mxu3 %v908_v15 }
 0x356   :  { %v323_v51 = vpop.f32.mrf.mxu3 }
 0x357   :  { %v324_v52 = vadd.f32 %v935_v50, %v323_v51 }
 0x359   :  { %v374_v53 = vsel %vm373_vm0, %v324_v52, -1e+30 }
 0x35a   :  { %390 = vmax.xlane.f32.xlu0 %v374_v53 }
 0x35e   :  { %v326_v54 = vpop.f32.mrf.mxu3 }
 0x35f   :  { %v327_v55 = vadd.f32 %v935_v50, %v326_v54 }
 0x361   :  { %v944_v56 = vsel %vm373_vm0, %v327_v55, -1e+30 }
 0x362   :  { %392 = vmax.xlane.f32.xlu0 %v944_v56 }
 0x366   :  { %v329_v60 = vpop.f32.mrf.mxu3 }
 0x367   :  { %v330_v1 = vadd.f32 %v935_v50, %v329_v60 }
 0x369   :  { %v950_v6 = vsel %vm373_vm0, %v330_v1, -1e+30 }
 0x36a   :  { %394 = vmax.xlane.f32.xlu1 %v950_v6 }
 0x36e   :  { %v332_v10 = vpop.f32.mrf.mxu3 }
 0x36f   :  { %v333_v13 = vadd.f32 %v935_v50, %v332_v10 }
 0x371   :  { %v956_v14 = vsel %vm373_vm0, %v333_v13, -1e+30 }
 0x372   :  { %396 = vmax.xlane.f32.xlu1 %v956_v14 }
 0x376   :  { %v335_v15 = vpop.f32.mrf.mxu3 }
 0x377   :  { %v336_v16 = vadd.f32 %v935_v50, %v335_v15 }
 0x379   :  { %v962_v34 = vsel %vm373_vm0, %v336_v16, -1e+30 }
 0x37a   :  { %398 = vmax.xlane.f32.xlu2 %v962_v34 }
 0x37e   :  { %v338_v35 = vpop.f32.mrf.mxu3 }
 0x37f   :  { %v339_v36 = vadd.f32 %v935_v50, %v338_v35 }
 0x381   :  { %v968_v37 = vsel %vm373_vm0, %v339_v36, -1e+30 }
 0x382   :  { %400 = vmax.xlane.f32.xlu2 %v968_v37 }
 0x386   :  { %v341_v38 = vpop.f32.mrf.mxu3 }
 0x387   :  { %v342_v39 = vadd.f32 %v935_v50, %v341_v38 }
 0x389   :  { %v974_v40 = vsel %vm373_vm0, %v342_v39, -1e+30 }
 0x38a   :  { %402 = vmax.xlane.f32.xlu0 %v974_v40 }
 0x38e   :  { %v344_v41 = vpop.f32.mrf.mxu3 }
 0x38f   :  { %v345_v42 = vadd.f32 %v935_v50, %v344_v41 }
 0x391   :  { %v980_v43 = vsel %vm373_vm0, %v345_v42, -1e+30 }
 0x392   :  { %404 = vmax.xlane.f32.xlu1 %v980_v43 }
 0x396   :  { %v347_v44 = vpop.f32.mrf.mxu3 }
 0x397   :  { %v348_v45 = vadd.f32 %v935_v50, %v347_v44 }
 0x399   :  { %v986_v46 = vsel %vm373_vm0, %v348_v45, -1e+30 }
 0x39a   :  { %406 = vmax.xlane.f32.xlu2 %v986_v46 }
 0x39e   :  { %v350_v47 = vpop.f32.mrf.mxu3 }
 0x39f   :  { %v351_v57 = vadd.f32 %v935_v50, %v350_v47 }
 0x3a1   :  { %v992_v58 = vsel %vm373_vm0, %v351_v57, -1e+30 }
 0x3a2   :  { %408 = vmax.xlane.f32.xlu0 %v992_v58 }
 0x3a6   :  { %v353_v59 = vpop.f32.mrf.mxu3 }
 0x3a7   :  { %v354_v61 = vadd.f32 %v935_v50, %v353_v59 }
 0x3a9   :  { %v998_v62 = vsel %vm373_vm0, %v354_v61, -1e+30 }
 0x3aa   :  { %410 = vmax.xlane.f32.xlu1 %v998_v62 }
 0x3ae   :  { %v356_v63 = vpop.f32.mrf.mxu3 }
 0x3af   :  { %v357_v0 = vadd.f32 %v935_v50, %v356_v63 }
 0x3b1   :  { %v1004_v2 = vsel %vm373_vm0, %v357_v0, -1e+30 }
 0x3b2   :  { %412 = vmax.xlane.f32.xlu2 %v1004_v2 }
 0x3b6   :  { %v359_v3 = vpop.f32.mrf.mxu3 }
 0x3b7   :  { %v360_v4 = vadd.f32 %v935_v50, %v359_v3 }
 0x3b9   :  { %v1010_v5 = vsel %vm373_vm0, %v360_v4, -1e+30 }
 0x3ba   :  { %414 = vmax.xlane.f32.xlu0 %v1010_v5 }
 0x3be   :  { %v362_v7 = vpop.f32.mrf.mxu3 }
 0x3bf   :  { %v363_v8 = vadd.f32 %v935_v50, %v362_v7 }
 0x3c1   :  { %v1016_v9 = vsel %vm373_vm0, %v363_v8, -1e+30 }
 0x3c2   :  { %416 = vmax.xlane.f32.xlu1 %v1016_v9 }
 0x3c6   :  { %v365_v11 = vpop.f32.mrf.mxu3 }
 0x3c7   :  { %v366_v12 = vadd.f32 %v935_v50, %v365_v11 }
 0x3c9   :  { %v1022_v17 = vsel %vm373_vm0, %v366_v12, -1e+30 }
 0x3ca   :  { %418 = vmax.xlane.f32.xlu2 %v1022_v17 }
 0x3cd   :  { %v391_v18 = vpop.xlane.xlu0 %390 }
 0x3ce   :  { %v1025_v19 = vsub.f32 %v374_v53, %v391_v18  ;;  %v368_v20 = vpop.f32.mrf.mxu3 }
 0x3cf   :  { %v369_v21 = vadd.f32 %v935_v50, %v368_v20 }
 0x3d0   :  { %v438_v22 = vmul.f32 1.442695, %v1025_v19 }
 0x3d1   :  { %v1031_v23 = vsel %vm373_vm0, %v369_v21, -1e+30 }
 0x3d2   :  { %572 = vpow2.f32 %v438_v22  ;;  %420 = vmax.xlane.f32.xlu0 %v1031_v23 }
 0x3d5   :  { %v393_v24 = vpop.xlane.xlu0 %392 }
 0x3d6   :  { %v1035_v25 = vsub.f32 %v944_v56, %v393_v24 }
 0x3d8   :  { %v573_v26 = vpop.eup %572  ;;  %v440_v27 = vmul.f32 1.442695, %v1035_v25 }
 0x3d9   :  { %470 = vadd.xlane.f32.xlu1 %v573_v26 }
 0x3da   :  { %574 = vpow2.f32 %v440_v27 }
 0x3dd   :  { %v395_v28 = vpop.xlane.xlu1 %394 }
 0x3de   :  { %v1039_v29 = vsub.f32 %v950_v6, %v395_v28 }
 0x3e0   :  { %v575_v30 = vpop.eup %574  ;;  %v442_v31 = vmul.f32 1.442695, %v1039_v29 }
 0x3e1   :  { %472 = vadd.xlane.f32.xlu2 %v575_v30 }
 0x3e2   :  { %576 = vpow2.f32 %v442_v31 }
 0x3e5   :  { %v397_v32 = vpop.xlane.xlu1 %396 }
 0x3e6   :  { %v1043_v33 = vsub.f32 %v956_v14, %v397_v32 }
 0x3e8   :  { %v577_v48 = vpop.eup %576  ;;  %v444_v49 = vmul.f32 1.442695, %v1043_v33 }
 0x3e9   :  { %474 = vadd.xlane.f32.xlu0 %v577_v48 }
 0x3ea   :  { %578 = vpow2.f32 %v444_v49 }
 0x3ed   :  { %v399_v50 = vpop.xlane.xlu2 %398 }
 0x3ee   :  { %v1047_v51 = vsub.f32 %v962_v34, %v399_v50 }
 0x3f0   :  { %v579_v52 = vpop.eup %578  ;;  %v446_v53 = vmul.f32 1.442695, %v1047_v51 }
 0x3f1   :  { %476 = vadd.xlane.f32.xlu1 %v579_v52 }
 0x3f2   :  { %580 = vpow2.f32 %v446_v53 }
 0x3f5   :  { %v401_v54 = vpop.xlane.xlu2 %400 }
 0x3f6   :  { %v1051_v55 = vsub.f32 %v968_v37, %v401_v54 }
 0x3f8   :  { %v581_v56 = vpop.eup %580  ;;  %v448_v60 = vmul.f32 1.442695, %v1051_v55 }
 0x3f9   :  { %478 = vadd.xlane.f32.xlu2 %v581_v56 }
 0x3fa   :  { %582 = vpow2.f32 %v448_v60 }
 0x3fd   :  { %v403_v1 = vpop.xlane.xlu0 %402 }
 0x3fe   :  { %v1055_v6 = vsub.f32 %v974_v40, %v403_v1 }
 0x400   :  { %v583_v10 = vpop.eup %582  ;;  %v450_v13 = vmul.f32 1.442695, %v1055_v6 }
 0x401   :  { %480 = vadd.xlane.f32.xlu0 %v583_v10 }
 0x402   :  { %584 = vpow2.f32 %v450_v13 }
 0x405   :  { %v405_v14 = vpop.xlane.xlu1 %404 }
 0x406   :  { %v1059_v15 = vsub.f32 %v980_v43, %v405_v14 }
 0x408   :  { %v585_v16 = vpop.eup %584  ;;  %v452_v34 = vmul.f32 1.442695, %v1059_v15 }
 0x409   :  { %482 = vadd.xlane.f32.xlu1 %v585_v16 }
 0x40a   :  { %586 = vpow2.f32 %v452_v34 }
 0x40d   :  { %v407_v35 = vpop.xlane.xlu2 %406 }
 0x40e   :  { %v1063_v36 = vsub.f32 %v986_v46, %v407_v35 }
 0x410   :  { %v587_v37 = vpop.eup %586  ;;  %v454_v38 = vmul.f32 1.442695, %v1063_v36 }
 0x411   :  { %484 = vadd.xlane.f32.xlu2 %v587_v37 }
 0x412   :  { %588 = vpow2.f32 %v454_v38 }
 0x415   :  { %v409_v39 = vpop.xlane.xlu0 %408 }
 0x416   :  { %v1067_v40 = vsub.f32 %v992_v58, %v409_v39 }
 0x418   :  { %v589_v41 = vpop.eup %588  ;;  %v456_v42 = vmul.f32 1.442695, %v1067_v40 }
 0x419   :  { %486 = vadd.xlane.f32.xlu0 %v589_v41 }
 0x41a   :  { %590 = vpow2.f32 %v456_v42 }
 0x41d   :  { %v411_v43 = vpop.xlane.xlu1 %410 }
 0x41e   :  { %v1071_v44 = vsub.f32 %v998_v62, %v411_v43 }
 0x420   :  { %v591_v45 = vpop.eup %590  ;;  %v458_v46 = vmul.f32 1.442695, %v1071_v44 }
 0x421   :  { %488 = vadd.xlane.f32.xlu1 %v591_v45 }
 0x422   :  { %592 = vpow2.f32 %v458_v46 }
 0x425   :  { %v413_v47 = vpop.xlane.xlu2 %412 }
 0x426   :  { %v1075_v57 = vsub.f32 %v1004_v2, %v413_v47 }
 0x428   :  { %v593_v58 = vpop.eup %592  ;;  %v460_v59 = vmul.f32 1.442695, %v1075_v57 }
 0x429   :  { %490 = vadd.xlane.f32.xlu2 %v593_v58 }
 0x42a   :  { %594 = vpow2.f32 %v460_v59 }
 0x42d   :  { %v415_v61 = vpop.xlane.xlu0 %414 }
 0x42e   :  { %v1079_v63 = vsub.f32 %v1010_v5, %v415_v61 }
 0x430   :  { %v595_v62 = vpop.eup %594  ;;  %v462_v0 = vmul.f32 1.442695, %v1079_v63 }
 0x431   :  { %492 = vadd.xlane.f32.xlu0 %v595_v62 }
 0x432   :  { %596 = vpow2.f32 %v462_v0 }
 0x435   :  { %v417_v3 = vpop.xlane.xlu1 %416 }
 0x436   :  { %v1083_v4 = vsub.f32 %v1016_v9, %v417_v3 }
 0x438   :  { %v597_v2 = vpop.eup %596  ;;  %v464_v7 = vmul.f32 1.442695, %v1083_v4 }
 0x439   :  { %494 = vadd.xlane.f32.xlu1 %v597_v2 }
 0x43a   :  { %598 = vpow2.f32 %v464_v7 }
 0x43d   :  { %v419_v8 = vpop.xlane.xlu2 %418 }
 0x43e   :  { %v1087_v11 = vsub.f32 %v1022_v17, %v419_v8 }
 0x440   :  { %v599_v5 = vpop.eup %598  ;;  %v466_v12 = vmul.f32 1.442695, %v1087_v11 }
 0x441   :  { %496 = vadd.xlane.f32.xlu2 %v599_v5 }
 0x442   :  { %600 = vpow2.f32 %v466_v12 }
 0x445   :  { %v421_v18 = vpop.xlane.xlu0 %420 }
 0x446   :  { %v1091_v20 = vsub.f32 %v1031_v23, %v421_v18 }
 0x448   :  { %v601_v9 = vpop.eup %600  ;;  %v468_v21 = vmul.f32 1.442695, %v1091_v20 }
 0x449   :  { %498 = vadd.xlane.f32.xlu0 %v601_v9 }
 0x44a   :  { %602 = vpow2.f32 %v468_v21 }
 0x44c   :  { %v471_v22 = vpop.xlane.xlu1 %470 }
 0x44d   :  { %604 = vlog2.f32 %v471_v22 }
 0x450   :  { %v603_v24 = vpop.eup %602 }
 0x451   :  { %500 = vadd.xlane.f32.xlu1 %v603_v24 }
 0x453   :  { %v605_v17 = vpop.eup %604 }
 0x454   :  { %v503_v26 = vmul.f32 0.6931472, %v605_v17  ;;  %v473_v27 = vpop.xlane.xlu2 %472 }
 0x455   :  { %606 = vlog2.f32 %v473_v27 }
 0x456   :  { %v534_v28 = vsub.f32 %v1025_v19, %v503_v26 }
 0x458   :  { %550 = vst [vmem:[%s1164_s6] sm:$0xff] %v534_v28 }
 0x45b   :  { %v607_v23 = vpop.eup %606 }
 0x45c   :  { %v505_v30 = vmul.f32 0.6931472, %v607_v23  ;;  %v475_v31 = vpop.xlane.xlu0 %474 }
 0x45d   :  { %608 = vlog2.f32 %v475_v31 }
 0x45e   :  { %v535_v32 = vsub.f32 %v1035_v25, %v505_v30 }
 0x460   :  { %551 = vst [vmem:[%s1164_s6 + $0x8] sm:$0xff] %v535_v32 }
 0x463   :  { %v609_v48 = vpop.eup %608 }
 0x464   :  { %v507_v49 = vmul.f32 0.6931472, %v609_v48  ;;  %v477_v50 = vpop.xlane.xlu1 %476 }
 0x465   :  { %610 = vlog2.f32 %v477_v50 }
 0x466   :  { %v536_v19 = vsub.f32 %v1039_v29, %v507_v49 }
 0x468   :  { %552 = vst [vmem:[%s1164_s6 + $0x10] sm:$0xff] %v536_v19 }
 0x46b   :  { %v611_v52 = vpop.eup %610 }
 0x46c   :  { %v509_v53 = vmul.f32 0.6931472, %v611_v52  ;;  %v479_v54 = vpop.xlane.xlu2 %478 }
 0x46d   :  { %612 = vlog2.f32 %v479_v54 }
 0x46e   :  { %v537_v25 = vsub.f32 %v1043_v33, %v509_v53 }
 0x470   :  { %553 = vst [vmem:[%s1164_s6 + $0x18] sm:$0xff] %v537_v25 }
 0x473   :  { %v613_v56 = vpop.eup %612 }
 0x474   :  { %v511_v60 = vmul.f32 0.6931472, %v613_v56  ;;  %v481_v1 = vpop.xlane.xlu0 %480 }
 0x475   :  { %614 = vlog2.f32 %v481_v1 }
 0x476   :  { %v538_v29 = vsub.f32 %v1047_v51, %v511_v60 }
 0x478   :  { %554 = vst [vmem:[%s1164_s6 + $0x20] sm:$0xff] %v538_v29 }
 0x47b   :  { %v615_v10 = vpop.eup %614 }
 0x47c   :  { %v513_v13 = vmul.f32 0.6931472, %v615_v10  ;;  %v483_v14 = vpop.xlane.xlu1 %482 }
 0x47d   :  { %616 = vlog2.f32 %v483_v14 }
 0x47e   :  { %v539_v33 = vsub.f32 %v1051_v55, %v513_v13 }
 0x480   :  { %555 = vst [vmem:[%s1164_s6 + $0x28] sm:$0xff] %v539_v33 }
 0x483   :  { %v617_v16 = vpop.eup %616 }
 0x484   :  { %v515_v34 = vmul.f32 0.6931472, %v617_v16  ;;  %v485_v35 = vpop.xlane.xlu2 %484 }
 0x485   :  { %618 = vlog2.f32 %v485_v35 }
 0x486   :  { %v540_v51 = vsub.f32 %v1055_v6, %v515_v34 }
 0x488   :  { %556 = vst [vmem:[%s1164_s6 + $0x30] sm:$0xff] %v540_v51 }
 0x48b   :  { %v619_v37 = vpop.eup %618 }
 0x48c   :  { %v517_v38 = vmul.f32 0.6931472, %v619_v37  ;;  %v487_v39 = vpop.xlane.xlu0 %486 }
 0x48d   :  { %620 = vlog2.f32 %v487_v39 }
 0x48e   :  { %v541_v55 = vsub.f32 %v1059_v15, %v517_v38 }
 0x490   :  { %557 = vst [vmem:[%s1164_s6 + $0x38] sm:$0xff] %v541_v55 }
 0x493   :  { %v621_v41 = vpop.eup %620 }
 0x494   :  { %v519_v42 = vmul.f32 0.6931472, %v621_v41  ;;  %v489_v43 = vpop.xlane.xlu1 %488 }
 0x495   :  { %622 = vlog2.f32 %v489_v43 }
 0x496   :  { %v542_v6 = vsub.f32 %v1063_v36, %v519_v42 }
 0x498   :  { %558 = vst [vmem:[%s1164_s6 + $0x40] sm:$0xff] %v542_v6 }
 0x49b   :  { %v623_v45 = vpop.eup %622 }
 0x49c   :  { %v521_v46 = vmul.f32 0.6931472, %v623_v45  ;;  %v491_v47 = vpop.xlane.xlu2 %490 }
 0x49d   :  { %624 = vlog2.f32 %v491_v47 }
 0x49e   :  { %v543_v15 = vsub.f32 %v1067_v40, %v521_v46 }
 0x4a0   :  { %559 = vst [vmem:[%s1164_s6 + $0x48] sm:$0xff] %v543_v15 }
 0x4a3   :  { %v625_v58 = vpop.eup %624 }
 0x4a4   :  { %v523_v59 = vmul.f32 0.6931472, %v625_v58  ;;  %v493_v61 = vpop.xlane.xlu0 %492 }
 0x4a5   :  { %626 = vlog2.f32 %v493_v61 }
 0x4a6   :  { %v544_v36 = vsub.f32 %v1071_v44, %v523_v59 }
 0x4a8   :  { %560 = vst [vmem:[%s1164_s6 + $0x50] sm:$0xff] %v544_v36 }
 0x4ab   :  { %v627_v62 = vpop.eup %626 }
 0x4ac   :  { %v525_v0 = vmul.f32 0.6931472, %v627_v62  ;;  %v495_v3 = vpop.xlane.xlu1 %494 }
 0x4ad   :  { %628 = vlog2.f32 %v495_v3 }
 0x4ae   :  { %v545_v40 = vsub.f32 %v1075_v57, %v525_v0 }
 0x4b0   :  { %561 = vst [vmem:[%s1164_s6 + $0x58] sm:$0xff] %v545_v40 }
 0x4b3   :  { %v629_v2 = vpop.eup %628 }
 0x4b4   :  { %v527_v7 = vmul.f32 0.6931472, %v629_v2  ;;  %v497_v8 = vpop.xlane.xlu2 %496 }
 0x4b5   :  { %630 = vlog2.f32 %v497_v8 }
 0x4b6   :  { %v546_v44 = vsub.f32 %v1079_v63, %v527_v7 }
 0x4b8   :  { %562 = vst [vmem:[%s1164_s6 + $0x60] sm:$0xff] %v546_v44 }
 0x4bb   :  { %v631_v5 = vpop.eup %630 }
 0x4bc   :  { %v529_v12 = vmul.f32 0.6931472, %v631_v5  ;;  %v499_v18 = vpop.xlane.xlu0 %498 }
 0x4bd   :  { %632 = vlog2.f32 %v499_v18 }
 0x4be   :  { %v547_v57 = vsub.f32 %v1083_v4, %v529_v12 }
 0x4c0   :  { %563 = vst [vmem:[%s1164_s6 + $0x68] sm:$0xff] %v547_v57 }
 0x4c3   :  { %v633_v9 = vpop.eup %632 }
 0x4c4   :  { %v531_v21 = vmul.f32 0.6931472, %v633_v9  ;;  %v501_v22 = vpop.xlane.xlu1 %500 }
 0x4c5   :  { %634 = vlog2.f32 %v501_v22 }
 0x4c6   :  { %v548_v63 = vsub.f32 %v1087_v11, %v531_v21 }
 0x4c8   :  { %564 = vst [vmem:[%s1164_s6 + $0x70] sm:$0xff] %v548_v63 }
 0x4cb   :  { %v635_v24 = vpop.eup %634 }
 0x4cc   :  { %v533_v17 = vmul.f32 0.6931472, %v635_v24 }
 0x4ce   :  { %v549_v26 = vsub.f32 %v1091_v20, %v533_v17 }
 0x4d0   :  { %565 = vst [vmem:[%s1164_s6 + $0x78] sm:$0xff] %v549_v26 }

</bundles_post_ra>
